<compile_context>
chip_gen: v7x
topology: tpu7x:2x2x1
jax: 0.10.0
libtpu: 0.0.40
codegen_flags: <defaults>
</compile_context>

<pallas_src>
import jax
import jax.numpy as jnp
from jax.experimental import pallas as pl
from jax.experimental.pallas import tpu as pltpu


def _make_shape_print_kernel(shape):
    """Build a tiny kernel that prints the (static) shape and writes a token."""
    msg = f"torch.Size({list(shape)})"  # no '{'/'}' chars -> safe as a fmt string

    def kernel(o_ref):
        # Per-execution device-side print of the tensor size.
        # TODO(synk): torch prints to host stdout every call; on TPU this is
        # only surfaced with --xla_tpu_enable_log_recorder (or interpret mode).
        pl.debug_print(msg)
        # Write the full (tiny) output so the token is well-defined.
        o_ref[...] = jnp.zeros_like(o_ref)

    return kernel


def print_layer(x: jax.Array) -> jax.Array:
    """Pallas implementation of PrintLayer.forward: print(x.size()); return x."""
    # Host-side metadata print (trace-time under jit, per-call in eager mode),
    # mirroring PyTorch's print of static size metadata.
    print(f"torch.Size({list(x.shape)})")

    # Tiny side-effect-only Pallas kernel: one 8x128 int32 token (4 KiB),
    # no grid, no tensor streaming. has_side_effects=True prevents DCE.
    token = pl.pallas_call(
        _make_shape_print_kernel(x.shape),
        out_shape=jax.ShapeDtypeStruct((8, 128), jnp.int32),
        compiler_params=pltpu.CompilerParams(has_side_effects=True),
    )()

    # Identity data path: no pallas copy, no HBM round trip. The optimization
    # barrier only establishes an ordering/liveness dependency on the print
    # kernel; with a donated input the returned value aliases x's buffer.
    x_out, _ = jax.lax.optimization_barrier((x, token))
    return x_out


if __name__ == "__main__":
    key = jax.random.PRNGKey(0)
    # Small NCHW input consistent with the module's usage context.
    x = jax.random.normal(key, (2, 4, 16, 16), dtype=jnp.float32)
    x_ref = jnp.array(x, copy=True)  # reference values (x is donated below)

    # Donate x so the identity output can alias the input buffer end-to-end.
    fwd = jax.jit(print_layer, donate_argnums=(0,))
    y = fwd(x)
    y = jax.block_until_ready(y)

    assert y.shape == x_ref.shape
    assert y.dtype == x_ref.dtype
    assert bool(jnp.all(y == x_ref))

    print("KERNEL_OK")
</pallas_src>

<mosaic_0001>
module attributes {stable_mosaic.version = 11 : i64} {
  func.func @kernel(%arg0: memref<8x128xi32, #tpu.memory_space<vmem>>) attributes {dimension_semantics = [], scalar_prefetch = 0 : i64, scratch_operands = 0 : i64, tpu.core_type = #tpu.core_type<tc>} {
    tpu.log "torch.Size([2, 4, 16, 16])"
    %c0_i32 = arith.constant 0 : i32
    %0 = vector.broadcast %c0_i32 : i32 to vector<8x128xi32>
    %c0 = arith.constant 0 : index
    %c0_0 = arith.constant 0 : index
    %1 = vector.load %arg0[%c0, %c0_0] : memref<8x128xi32, #tpu.memory_space<vmem>>, vector<8x128xi32>
    tpu.vector_store %arg0[%c0, %c0_0], %0 {strides = array<i32>} : memref<8x128xi32, #tpu.memory_space<vmem>>, vector<8x128xi32>,
    return
  }
}

</mosaic_0001>

<bundles_post_ra>
// kernel: print_layer.1
= control target key start
LH: loop header
LB: loop body
LE: loop exit
PB: predicated region body
PF: predicated region fallthrough
CT: control target
= control target key end

     0   :  { %5 = vsyncpa [#allocation3], 0  ;;  %s68_s0 = inlined_call_operand.hbm [shape: s32[8,128], index: 0, kind: output, shape index: {}]  }
   0x1   :  { %v49_v0 = vmov 0   ;;  %s50_s3 = smov [#allocation2]  }
   0x2   :  { %8 = vst [vmem:[#allocation2] sm:$0xff] %v49_v0  ;;  %s15_s4 = sshll.u32 %s50_s3, 4  ;;  %s16_s4 = int_to_ptr.vmem [resolvable:$true] %s15_s4 }
   0x3   :  { %s25_s5 = scalar_lea.vmem %s16_s4, 128  ;;  %p30_p1 = scmp.lt.s32.totalorder %s16_s4, %s16_s4 }
   0x4   :  { %p26_p0 = scmp.ne.s32.totalorder %s16_s4, %s25_s5  ;;  %p31_p2 = scmp.lt.s32.totalorder %s25_s5, %s25_s5 }
   0x6   :  { %p32_p3 = por %p31_p2, %p30_p1 }
   0x8   :  { %p33_p4 = pnand %p32_p3, %p26_p0 }
   0xa   :  { %36 = shalt.err (!%p33_p4)
}
   0xb   :  { %s37_s8 = scalar_lea.hbm %s68_s0, 128 }
   0xc   :  { %p38_p5 = scmp.ne.s32.totalorder %s68_s0, %s37_s8  ;;  %p41_p6 = scmp.lt.u32.totalorder %s37_s8, %s68_s0 }
   0xe   :  { %p43_p7 = pnand %p41_p6, %p38_p5 }
  0x10   :  { %46 = shalt.err (!%p43_p7)
}
  0x11   :  { %18 = dma.vmem_to_hbm [thread:$0]  %s16_s4, 128, %s68_s0, [#allocation3]  }
  0x12   :  { %47 = dma.done.wait [#allocation3], 128  }
  0x13   :  { %48 = vsyncadd [#allocation3], 4294967168 }
  0x14   :  { %22 = vsyncpa [#allocation3], 1 }

</bundles_post_ra>
